<compile_context>
chip_gen: v7x
topology: tpu7x:2x2x1
jax: 0.10.0
libtpu: 0.0.40
codegen_flags: <defaults>
</compile_context>

<pallas_src>
from functools import partial

import numpy as np
import jax
import jax.numpy as jnp
from jax import lax
from jax.experimental import pallas as pl
from jax.experimental.pallas import tpu as pltpu


# ---------------------------------------------------------------------------
# Pallas kernel: valid conv (no padding), arbitrary stride.
# ---------------------------------------------------------------------------
def _reconv_kernel(x_ref, w_ref, b_ref, o_ref, *, stride, K, W, H_out, W_out):
    # x_ref: (bb, C, H*W)          flattened NCHW image block (bb batch elements)
    # w_ref: (OC, K*K*C)           im2col-ordered dense weights (tap-major, chan-minor)
    # b_ref: (OC, 1)               per-output-channel bias column
    # o_ref: (bb, OC, H_out*W_out)
    bb, C, HW = x_ref.shape
    OC = o_ref.shape[1]
    # Flat-index span covering every valid output pixel p = (i*stride)*W + j*stride.
    L = (H_out - 1) * stride * W + (W_out - 1) * stride + 1

    w2d = w_ref[...]      # (OC, K*K*C) — loaded once, reused across the batch block
    bias = b_ref[...]     # (OC, 1)

    for b in range(bb):   # bb is 1 or B (tiny, static unroll)
        # im2col via shifted *ref* slices: output pixel p needs x_flat[c, p + kh*W + kw],
        # so each kernel tap is a statically-offset window of the flat image. No
        # in-register re-slicing of a materialized x, no transposes.
        cols = []
        for kh in range(K):
            for kw in range(K):
                d = kh * W + kw
                cols.append(x_ref[b, :, d:d + L])           # (C, L)
        cols = jnp.concatenate(cols, axis=0)                # (K*K*C, L)

        # Single MXU contraction over all taps & input channels, f32 accumulate.
        # Result is lane-dense: OC on sublanes, flat spatial on lanes.
        acc = lax.dot_general(w2d, cols, (((1,), (0,)), ((), ())),
                              preferred_element_type=jnp.float32)   # (OC, L)

        # Keep only valid output pixels (p = i*stride*W + j*stride) and pack them
        # contiguously so the store is one lane-dense (OC, H_out*W_out) block.
        sW = stride * W
        if stride == 1:
            rows = [acc[:, i * W:i * W + W_out] for i in range(H_out)]
        else:
            rows = [acc[:, i * sW:i * sW + (W_out - 1) * stride + 1:stride]
                    for i in range(H_out)]
        out = jnp.concatenate(rows, axis=1) + bias           # (OC, H_out*W_out)
        o_ref[b] = out.astype(o_ref.dtype)


def _batch_block_size(B):
    """v7x has 2 TensorCores/chip: keep a parallel batch grid axis so both cores get
    work. Single-TC gens (v5e/v6e) fold the whole batch into one grid step to avoid
    the ~0.35us/step fixed overhead on a kernel that is only a few us total."""
    try:
        kind = jax.devices()[0].device_kind.lower()
    except Exception:
        kind = ""
    return 1 if ("v7" in kind and B > 1) else B


def reconv_forward(x_nchw, w2d, bias_col, *, kernel_size, stride):
    """x_nchw: [B, C, H, W] -> [B, OC, H_out, W_out] (valid conv + bias)."""
    B, C, H, W = x_nchw.shape
    K = kernel_size
    OC = w2d.shape[0]
    H_out = (H - K) // stride + 1
    W_out = (W - K) // stride + 1

    # NCHW -> (B, C, H*W) is a contiguous (free) reshape; no transpose round trips.
    x_flat = jnp.reshape(x_nchw.astype(jnp.float32), (B, C, H * W))

    bb = _batch_block_size(B)
    grid = (B // bb,)

    flops = 2 * B * OC * H_out * W_out * K * K * C
    bytes_accessed = 4 * (x_flat.size + w2d.size + bias_col.size
                          + B * OC * H_out * W_out)

    out_flat = pl.pallas_call(
        partial(_reconv_kernel, stride=stride, K=K, W=W, H_out=H_out, W_out=W_out),
        out_shape=jax.ShapeDtypeStruct((B, OC, H_out * W_out), jnp.float32),
        grid=grid,
        in_specs=[
            pl.BlockSpec((bb, C, H * W), lambda i: (i, 0, 0)),
            pl.BlockSpec((OC, K * K * C), lambda i: (0, 0)),
            pl.BlockSpec((OC, 1), lambda i: (0, 0)),
        ],
        out_specs=pl.BlockSpec((bb, OC, H_out * W_out), lambda i: (i, 0, 0)),
        compiler_params=pltpu.CompilerParams(dimension_semantics=("parallel",)),
        cost_estimate=pl.CostEstimate(flops=flops, transcendentals=0,
                                      bytes_accessed=bytes_accessed),
    )(x_flat, w2d, bias_col)

    # (B, OC, H_out*W_out) -> NCHW output: contiguous reshape, free.
    return jnp.reshape(out_flat, (B, OC, H_out, W_out))


# ---------------------------------------------------------------------------
# ReConv-equivalent wrapper: takes the sparse state dicts, densifies (glue) into the
# layout the kernel consumes, and calls the Pallas kernel in forward().
# ---------------------------------------------------------------------------
class ReConvPallas:
    def __init__(self, in_channels, out_channels, kernel_size, stride,
                 row_size, col_size, weight_state_dict, bias_state_dict):
        self.in_channels = in_channels
        self.out_channels = out_channels
        self.kernel_size = kernel_size
        self.stride = stride
        self.H_out = (row_size - kernel_size) // stride + 1
        self.W_out = (col_size - kernel_size) // stride + 1

        weight_index, weight_value, filter_lengths, start_points = weight_state_dict
        bias_index, bias_value = bias_state_dict

        wi = np.asarray(weight_index, dtype=np.int64)
        wv = np.asarray(weight_value, dtype=np.float32)
        fl = np.asarray(filter_lengths, dtype=np.int64)
        sp = np.asarray(start_points, dtype=np.int64)

        # Densify sparse weights directly into the im2col layout the kernel uses:
        # w2d[oc, (kh*K + kw)*C + ic]. weight_index encodes ic*100 + kh*10 + kw.
        K, C, OC = kernel_size, in_channels, out_channels
        w2d = np.zeros((OC, K * K * C), dtype=np.float32)
        for oc in range(OC):
            for i in range(int(fl[oc])):
                loc = int(sp[oc]) + i
                code = int(wi[loc])
                ic = code // 100
                kh = (code // 10) % 10
                kw = code % 10
                w2d[oc, (kh * K + kw) * C + ic] += float(wv[loc])

        bias = np.zeros((OC,), dtype=np.float32)
        bi = np.asarray(bias_index, dtype=np.int64)
        bv = np.asarray(bias_value, dtype=np.float32)
        for j in range(len(bi)):
            bias[int(bi[j])] += float(bv[j])

        self.w2d = jnp.asarray(w2d)                      # (OC, K*K*C)
        self.bias_col = jnp.asarray(bias[:, None])       # (OC, 1)

    def forward(self, x_nchw):
        return reconv_forward(x_nchw, self.w2d, self.bias_col,
                              kernel_size=self.kernel_size, stride=self.stride)


# ---------------------------------------------------------------------------
# Build deterministic sparse parameters + run.
# ---------------------------------------------------------------------------
def _make_sparse_params(key, out_channels, in_channels, kernel_size, keep_prob=0.6):
    """Build (weight_index, weight_value, filter_lengths, start_points) + dense ref."""
    k1, k2 = jax.random.split(key)
    dense = jax.random.normal(
        k1, (out_channels, in_channels, kernel_size, kernel_size), dtype=jnp.float32)
    keep = (jax.random.uniform(
        k2, (out_channels, in_channels, kernel_size, kernel_size)) < keep_prob)
    dense = np.asarray(dense * keep.astype(jnp.float32))  # pruned OIHW weights

    weight_index, weight_value, filter_lengths, start_points = [], [], [], []
    start = 0
    for oc in range(out_channels):
        start_points.append(start)
        count = 0
        for ic in range(in_channels):
            for kh in range(kernel_size):
                for kw in range(kernel_size):
                    v = dense[oc, ic, kh, kw]
                    if v != 0.0:
                        weight_index.append(ic * 100 + kh * 10 + kw)
                        weight_value.append(v)
                        count += 1
        filter_lengths.append(count)
        start += count

    wsd = (np.asarray(weight_index, np.int64),
           np.asarray(weight_value, np.float32),
           np.asarray(filter_lengths, np.int32),
           np.asarray(start_points, np.int32))
    return wsd, dense


if __name__ == "__main__":
    B, C_in, OC = 2, 4, 8
    H = W = 16
    K, stride = 3, 1

    key = jax.random.PRNGKey(0)
    kx, kw_key, kb = jax.random.split(key, 3)

    # Sparse conv parameters (what the torch module's __init__ receives).
    weight_state_dict, dense_oihw = _make_sparse_params(kw_key, OC, C_in, K)
    bias_index = np.array([1, 3, 6], dtype=np.int32)
    bias_value = np.asarray(jax.random.normal(kb, (3,), dtype=jnp.float32))
    bias_state_dict = (bias_index, bias_value)

    module = ReConvPallas(C_in, OC, K, stride, H, W,
                          weight_state_dict, bias_state_dict)

    # layout: input is NCHW, matching the PyTorch/CUDA module.
    x = jax.random.normal(kx, (B, C_in, H, W), dtype=jnp.float32)

    out = module.forward(x)
    out = jax.block_until_ready(out)

    # Reference: dense valid conv + bias (plain JAX, NCHW/OIHW).
    dense_bias = np.zeros((OC,), np.float32)
    for j, bi in enumerate(bias_index):
        dense_bias[int(bi)] += bias_value[j]
    ref = jax.lax.conv_general_dilated(
        x, jnp.asarray(dense_oihw), window_strides=(stride, stride),
        padding="VALID", dimension_numbers=("NCHW", "OIHW", "NCHW"))
    ref = ref + jnp.asarray(dense_bias)[None, :, None, None]
    ref = jax.block_until_ready(ref)

    np.testing.assert_allclose(np.asarray(out), np.asarray(ref),
                               rtol=1e-4, atol=1e-4)
    assert out.shape == (B, OC, module.H_out, module.W_out)
    print("KERNEL_OK")
</pallas_src>

<mosaic_0001>
module attributes {stable_mosaic.version = 11 : i64} {
  func.func @_reconv_kernel(%arg0: i32, %arg1: memref<2x4x256xf32, #tpu.memory_space<vmem>>, %arg2: memref<8x36xf32, #tpu.memory_space<vmem>>, %arg3: memref<8x1xf32, #tpu.memory_space<vmem>>, %arg4: memref<2x8x196xf32, #tpu.memory_space<vmem>>) attributes {dimension_semantics = [#tpu.dimension_semantics<parallel>], iteration_bounds = array<i64: 1>, scalar_prefetch = 0 : i64, scratch_operands = 0 : i64, tpu.core_type = #tpu.core_type<tc>, window_params = [{transform_indices = @transform_0, window_bounds = array<i64: 2, 4, 256>}, {pipeline_mode = #tpu.pipeline_mode<synchronous>, transform_indices = @transform_1, window_bounds = array<i64: 8, 36>}, {pipeline_mode = #tpu.pipeline_mode<synchronous>, transform_indices = @transform_2, window_bounds = array<i64: 8, 1>}, {transform_indices = @transform_3, window_bounds = array<i64: 2, 8, 196>}]} {
    %c0 = arith.constant 0 : index
    %c0_0 = arith.constant 0 : index
    %0 = vector.load %arg2[%c0, %c0_0] : memref<8x36xf32, #tpu.memory_space<vmem>>, vector<8x36xf32>
    %c0_1 = arith.constant 0 : index
    %c0_2 = arith.constant 0 : index
    %1 = vector.load %arg3[%c0_1, %c0_2] : memref<8x1xf32, #tpu.memory_space<vmem>>, vector<8x1xf32>
    %c0_3 = arith.constant 0 : index
    %c0_4 = arith.constant 0 : index
    %c0_5 = arith.constant 0 : index
    %2 = vector.load %arg1[%c0_3, %c0_4, %c0_5] : memref<2x4x256xf32, #tpu.memory_space<vmem>>, vector<1x4x222xf32>
    %3 = vector.shape_cast %2 : vector<1x4x222xf32> to vector<4x222xf32>
    %c0_6 = arith.constant 0 : index
    %c0_7 = arith.constant 0 : index
    %c1 = arith.constant 1 : index
    %4 = vector.load %arg1[%c0_6, %c0_7, %c1] : memref<2x4x256xf32, #tpu.memory_space<vmem>>, vector<1x4x222xf32>
    %5 = vector.shape_cast %4 : vector<1x4x222xf32> to vector<4x222xf32>
    %c0_8 = arith.constant 0 : index
    %c0_9 = arith.constant 0 : index
    %c2 = arith.constant 2 : index
    %6 = vector.load %arg1[%c0_8, %c0_9, %c2] : memref<2x4x256xf32, #tpu.memory_space<vmem>>, vector<1x4x222xf32>
    %7 = vector.shape_cast %6 : vector<1x4x222xf32> to vector<4x222xf32>
    %c0_10 = arith.constant 0 : index
    %c0_11 = arith.constant 0 : index
    %c16 = arith.constant 16 : index
    %8 = vector.load %arg1[%c0_10, %c0_11, %c16] : memref<2x4x256xf32, #tpu.memory_space<vmem>>, vector<1x4x222xf32>
    %9 = vector.shape_cast %8 : vector<1x4x222xf32> to vector<4x222xf32>
    %c0_12 = arith.constant 0 : index
    %c0_13 = arith.constant 0 : index
    %c17 = arith.constant 17 : index
    %10 = vector.load %arg1[%c0_12, %c0_13, %c17] : memref<2x4x256xf32, #tpu.memory_space<vmem>>, vector<1x4x222xf32>
    %11 = vector.shape_cast %10 : vector<1x4x222xf32> to vector<4x222xf32>
    %c0_14 = arith.constant 0 : index
    %c0_15 = arith.constant 0 : index
    %c18 = arith.constant 18 : index
    %12 = vector.load %arg1[%c0_14, %c0_15, %c18] : memref<2x4x256xf32, #tpu.memory_space<vmem>>, vector<1x4x222xf32>
    %13 = vector.shape_cast %12 : vector<1x4x222xf32> to vector<4x222xf32>
    %c0_16 = arith.constant 0 : index
    %c0_17 = arith.constant 0 : index
    %c32 = arith.constant 32 : index
    %14 = vector.load %arg1[%c0_16, %c0_17, %c32] : memref<2x4x256xf32, #tpu.memory_space<vmem>>, vector<1x4x222xf32>
    %15 = vector.shape_cast %14 : vector<1x4x222xf32> to vector<4x222xf32>
    %c0_18 = arith.constant 0 : index
    %c0_19 = arith.constant 0 : index
    %c33 = arith.constant 33 : index
    %16 = vector.load %arg1[%c0_18, %c0_19, %c33] : memref<2x4x256xf32, #tpu.memory_space<vmem>>, vector<1x4x222xf32>
    %17 = vector.shape_cast %16 : vector<1x4x222xf32> to vector<4x222xf32>
    %c0_20 = arith.constant 0 : index
    %c0_21 = arith.constant 0 : index
    %c34 = arith.constant 34 : index
    %18 = vector.load %arg1[%c0_20, %c0_21, %c34] : memref<2x4x256xf32, #tpu.memory_space<vmem>>, vector<1x4x222xf32>
    %19 = vector.shape_cast %18 : vector<1x4x222xf32> to vector<4x222xf32>
    %20 = tpu.concatenate %3, %5, %7, %9, %11, %13, %15, %17, %19 in 0 : vector<4x222xf32>, vector<4x222xf32>, vector<4x222xf32>, vector<4x222xf32>, vector<4x222xf32>, vector<4x222xf32>, vector<4x222xf32>, vector<4x222xf32>, vector<4x222xf32> -> vector<36x222xf32>
    %cst = arith.constant dense<0.000000e+00> : vector<8x222xf32>
    %21 = tpu.matmul %0, %20, %cst {dimension_numbers = #tpu.dot_dimension_numbers<[1], [0], [0], [1], [0, 0, 1, 1], [], []>} : vector<8x36xf32>, vector<36x222xf32>, vector<8x222xf32> -> vector<8x222xf32>
    %22 = vector.extract_strided_slice %21 {offsets = [0, 0], sizes = [8, 14], strides = [1, 1]} : vector<8x222xf32> to vector<8x14xf32>
    %23 = vector.extract_strided_slice %21 {offsets = [0, 16], sizes = [8, 14], strides = [1, 1]} : vector<8x222xf32> to vector<8x14xf32>
    %24 = vector.extract_strided_slice %21 {offsets = [0, 32], sizes = [8, 14], strides = [1, 1]} : vector<8x222xf32> to vector<8x14xf32>
    %25 = vector.extract_strided_slice %21 {offsets = [0, 48], sizes = [8, 14], strides = [1, 1]} : vector<8x222xf32> to vector<8x14xf32>
    %26 = vector.extract_strided_slice %21 {offsets = [0, 64], sizes = [8, 14], strides = [1, 1]} : vector<8x222xf32> to vector<8x14xf32>
    %27 = vector.extract_strided_slice %21 {offsets = [0, 80], sizes = [8, 14], strides = [1, 1]} : vector<8x222xf32> to vector<8x14xf32>
    %28 = vector.extract_strided_slice %21 {offsets = [0, 96], sizes = [8, 14], strides = [1, 1]} : vector<8x222xf32> to vector<8x14xf32>
    %29 = vector.extract_strided_slice %21 {offsets = [0, 112], sizes = [8, 14], strides = [1, 1]} : vector<8x222xf32> to vector<8x14xf32>
    %30 = vector.extract_strided_slice %21 {offsets = [0, 128], sizes = [8, 14], strides = [1, 1]} : vector<8x222xf32> to vector<8x14xf32>
    %31 = vector.extract_strided_slice %21 {offsets = [0, 144], sizes = [8, 14], strides = [1, 1]} : vector<8x222xf32> to vector<8x14xf32>
    %32 = vector.extract_strided_slice %21 {offsets = [0, 160], sizes = [8, 14], strides = [1, 1]} : vector<8x222xf32> to vector<8x14xf32>
    %33 = vector.extract_strided_slice %21 {offsets = [0, 176], sizes = [8, 14], strides = [1, 1]} : vector<8x222xf32> to vector<8x14xf32>
    %34 = vector.extract_strided_slice %21 {offsets = [0, 192], sizes = [8, 14], strides = [1, 1]} : vector<8x222xf32> to vector<8x14xf32>
    %35 = vector.extract_strided_slice %21 {offsets = [0, 208], sizes = [8, 14], strides = [1, 1]} : vector<8x222xf32> to vector<8x14xf32>
    %36 = tpu.concatenate %22, %23, %24, %25, %26, %27, %28, %29, %30, %31, %32, %33, %34, %35 in 1 : vector<8x14xf32>, vector<8x14xf32>, vector<8x14xf32>, vector<8x14xf32>, vector<8x14xf32>, vector<8x14xf32>, vector<8x14xf32>, vector<8x14xf32>, vector<8x14xf32>, vector<8x14xf32>, vector<8x14xf32>, vector<8x14xf32>, vector<8x14xf32>, vector<8x14xf32> -> vector<8x196xf32>
    %37 = vector.broadcast %1 : vector<8x1xf32> to vector<8x196xf32>
    %38 = arith.addf %36, %37 : vector<8x196xf32>
    %c0_22 = arith.constant 0 : index
    %c0_23 = arith.constant 0 : index
    %c0_24 = arith.constant 0 : index
    %39 = vector.load %arg4[%c0_22, %c0_23, %c0_24] : memref<2x8x196xf32, #tpu.memory_space<vmem>>, vector<1x8x196xf32>
    %40 = vector.shape_cast %39 : vector<1x8x196xf32> to vector<8x196xf32>
    %41 = vector.shape_cast %38 : vector<8x196xf32> to vector<1x8x196xf32>
    tpu.vector_store %arg4[%c0_22, %c0_23, %c0_24], %41 {strides = array<i32>} : memref<2x8x196xf32, #tpu.memory_space<vmem>>, vector<1x8x196xf32>,
    %c1_25 = arith.constant 1 : index
    %c0_26 = arith.constant 0 : index
    %c0_27 = arith.constant 0 : index
    %42 = vector.load %arg1[%c1_25, %c0_26, %c0_27] : memref<2x4x256xf32, #tpu.memory_space<vmem>>, vector<1x4x222xf32>
    %43 = vector.shape_cast %42 : vector<1x4x222xf32> to vector<4x222xf32>
    %c1_28 = arith.constant 1 : index
    %c0_29 = arith.constant 0 : index
    %c1_30 = arith.constant 1 : index
    %44 = vector.load %arg1[%c1_28, %c0_29, %c1_30] : memref<2x4x256xf32, #tpu.memory_space<vmem>>, vector<1x4x222xf32>
    %45 = vector.shape_cast %44 : vector<1x4x222xf32> to vector<4x222xf32>
    %c1_31 = arith.constant 1 : index
    %c0_32 = arith.constant 0 : index
    %c2_33 = arith.constant 2 : index
    %46 = vector.load %arg1[%c1_31, %c0_32, %c2_33] : memref<2x4x256xf32, #tpu.memory_space<vmem>>, vector<1x4x222xf32>
    %47 = vector.shape_cast %46 : vector<1x4x222xf32> to vector<4x222xf32>
    %c1_34 = arith.constant 1 : index
    %c0_35 = arith.constant 0 : index
    %c16_36 = arith.constant 16 : index
    %48 = vector.load %arg1[%c1_34, %c0_35, %c16_36] : memref<2x4x256xf32, #tpu.memory_space<vmem>>, vector<1x4x222xf32>
    %49 = vector.shape_cast %48 : vector<1x4x222xf32> to vector<4x222xf32>
    %c1_37 = arith.constant 1 : index
    %c0_38 = arith.constant 0 : index
    %c17_39 = arith.constant 17 : index
    %50 = vector.load %arg1[%c1_37, %c0_38, %c17_39] : memref<2x4x256xf32, #tpu.memory_space<vmem>>, vector<1x4x222xf32>
    %51 = vector.shape_cast %50 : vector<1x4x222xf32> to vector<4x222xf32>
    %c1_40 = arith.constant 1 : index
    %c0_41 = arith.constant 0 : index
    %c18_42 = arith.constant 18 : index
    %52 = vector.load %arg1[%c1_40, %c0_41, %c18_42] : memref<2x4x256xf32, #tpu.memory_space<vmem>>, vector<1x4x222xf32>
    %53 = vector.shape_cast %52 : vector<1x4x222xf32> to vector<4x222xf32>
    %c1_43 = arith.constant 1 : index
    %c0_44 = arith.constant 0 : index
    %c32_45 = arith.constant 32 : index
    %54 = vector.load %arg1[%c1_43, %c0_44, %c32_45] : memref<2x4x256xf32, #tpu.memory_space<vmem>>, vector<1x4x222xf32>
    %55 = vector.shape_cast %54 : vector<1x4x222xf32> to vector<4x222xf32>
    %c1_46 = arith.constant 1 : index
    %c0_47 = arith.constant 0 : index
    %c33_48 = arith.constant 33 : index
    %56 = vector.load %arg1[%c1_46, %c0_47, %c33_48] : memref<2x4x256xf32, #tpu.memory_space<vmem>>, vector<1x4x222xf32>
    %57 = vector.shape_cast %56 : vector<1x4x222xf32> to vector<4x222xf32>
    %c1_49 = arith.constant 1 : index
    %c0_50 = arith.constant 0 : index
    %c34_51 = arith.constant 34 : index
    %58 = vector.load %arg1[%c1_49, %c0_50, %c34_51] : memref<2x4x256xf32, #tpu.memory_space<vmem>>, vector<1x4x222xf32>
    %59 = vector.shape_cast %58 : vector<1x4x222xf32> to vector<4x222xf32>
    %60 = tpu.concatenate %43, %45, %47, %49, %51, %53, %55, %57, %59 in 0 : vector<4x222xf32>, vector<4x222xf32>, vector<4x222xf32>, vector<4x222xf32>, vector<4x222xf32>, vector<4x222xf32>, vector<4x222xf32>, vector<4x222xf32>, vector<4x222xf32> -> vector<36x222xf32>
    %cst_52 = arith.constant dense<0.000000e+00> : vector<8x222xf32>
    %61 = tpu.matmul %0, %60, %cst_52 {dimension_numbers = #tpu.dot_dimension_numbers<[1], [0], [0], [1], [0, 0, 1, 1], [], []>} : vector<8x36xf32>, vector<36x222xf32>, vector<8x222xf32> -> vector<8x222xf32>
    %62 = vector.extract_strided_slice %61 {offsets = [0, 0], sizes = [8, 14], strides = [1, 1]} : vector<8x222xf32> to vector<8x14xf32>
    %63 = vector.extract_strided_slice %61 {offsets = [0, 16], sizes = [8, 14], strides = [1, 1]} : vector<8x222xf32> to vector<8x14xf32>
    %64 = vector.extract_strided_slice %61 {offsets = [0, 32], sizes = [8, 14], strides = [1, 1]} : vector<8x222xf32> to vector<8x14xf32>
    %65 = vector.extract_strided_slice %61 {offsets = [0, 48], sizes = [8, 14], strides = [1, 1]} : vector<8x222xf32> to vector<8x14xf32>
    %66 = vector.extract_strided_slice %61 {offsets = [0, 64], sizes = [8, 14], strides = [1, 1]} : vector<8x222xf32> to vector<8x14xf32>
    %67 = vector.extract_strided_slice %61 {offsets = [0, 80], sizes = [8, 14], strides = [1, 1]} : vector<8x222xf32> to vector<8x14xf32>
    %68 = vector.extract_strided_slice %61 {offsets = [0, 96], sizes = [8, 14], strides = [1, 1]} : vector<8x222xf32> to vector<8x14xf32>
    %69 = vector.extract_strided_slice %61 {offsets = [0, 112], sizes = [8, 14], strides = [1, 1]} : vector<8x222xf32> to vector<8x14xf32>
    %70 = vector.extract_strided_slice %61 {offsets = [0, 128], sizes = [8, 14], strides = [1, 1]} : vector<8x222xf32> to vector<8x14xf32>
    %71 = vector.extract_strided_slice %61 {offsets = [0, 144], sizes = [8, 14], strides = [1, 1]} : vector<8x222xf32> to vector<8x14xf32>
    %72 = vector.extract_strided_slice %61 {offsets = [0, 160], sizes = [8, 14], strides = [1, 1]} : vector<8x222xf32> to vector<8x14xf32>
    %73 = vector.extract_strided_slice %61 {offsets = [0, 176], sizes = [8, 14], strides = [1, 1]} : vector<8x222xf32> to vector<8x14xf32>
    %74 = vector.extract_strided_slice %61 {offsets = [0, 192], sizes = [8, 14], strides = [1, 1]} : vector<8x222xf32> to vector<8x14xf32>
    %75 = vector.extract_strided_slice %61 {offsets = [0, 208], sizes = [8, 14], strides = [1, 1]} : vector<8x222xf32> to vector<8x14xf32>
    %76 = tpu.concatenate %62, %63, %64, %65, %66, %67, %68, %69, %70, %71, %72, %73, %74, %75 in 1 : vector<8x14xf32>, vector<8x14xf32>, vector<8x14xf32>, vector<8x14xf32>, vector<8x14xf32>, vector<8x14xf32>, vector<8x14xf32>, vector<8x14xf32>, vector<8x14xf32>, vector<8x14xf32>, vector<8x14xf32>, vector<8x14xf32>, vector<8x14xf32>, vector<8x14xf32> -> vector<8x196xf32>
    %77 = vector.broadcast %1 : vector<8x1xf32> to vector<8x196xf32>
    %78 = arith.addf %76, %77 : vector<8x196xf32>
    %c1_53 = arith.constant 1 : index
    %c0_54 = arith.constant 0 : index
    %c0_55 = arith.constant 0 : index
    %79 = vector.load %arg4[%c1_53, %c0_54, %c0_55] : memref<2x8x196xf32, #tpu.memory_space<vmem>>, vector<1x8x196xf32>
    %80 = vector.shape_cast %79 : vector<1x8x196xf32> to vector<8x196xf32>
    %81 = vector.shape_cast %78 : vector<8x196xf32> to vector<1x8x196xf32>
    tpu.vector_store %arg4[%c1_53, %c0_54, %c0_55], %81 {strides = array<i32>} : memref<2x8x196xf32, #tpu.memory_space<vmem>>, vector<1x8x196xf32>,
    return
  }
  func.func @transform_0(%arg0: i32) -> (i32, i32, i32) {
    %c0_i32 = arith.constant 0 : i32
    %c0_i32_0 = arith.constant 0 : i32
    %c0_i32_1 = arith.constant 0 : i32
    return %arg0, %c0_i32, %c0_i32_0 : i32, i32, i32
  }
  func.func @transform_1(%arg0: i32) -> (i32, i32) {
    %c0_i32 = arith.constant 0 : i32
    %c0_i32_0 = arith.constant 0 : i32
    %c0_i32_1 = arith.constant 0 : i32
    return %c0_i32, %c0_i32_0 : i32, i32
  }
  func.func @transform_2(%arg0: i32) -> (i32, i32) {
    %c0_i32 = arith.constant 0 : i32
    %c0_i32_0 = arith.constant 0 : i32
    %c0_i32_1 = arith.constant 0 : i32
    return %c0_i32, %c0_i32_0 : i32, i32
  }
  func.func @transform_3(%arg0: i32) -> (i32, i32, i32) {
    %c0_i32 = arith.constant 0 : i32
    %c0_i32_0 = arith.constant 0 : i32
    %c0_i32_1 = arith.constant 0 : i32
    return %arg0, %c0_i32, %c0_i32_0 : i32, i32, i32
  }
}

</mosaic_0001>

<bundles_post_ra>
// kernel: tpu_custom_call.1
= control target key start
LH: loop header
LB: loop body
LE: loop exit
PB: predicated region body
PF: predicated region fallthrough
CT: control target
= control target key end

     0   :  { %8 = vsyncpa [#allocation3], 0  ;;  %s839_s0 = inlined_call_operand.hbm [shape: f32[2,4,256], index: 0, kind: input, shape index: {}]   ;;  %s840_s1 = inlined_call_operand.vmem [shape: f32[8,36], index: 1, kind: input, shape index: {}]   ;;  %s841_s2 = inlined_call_operand.vmem [shape: f32[8,1], index: 2, kind: input, shape index: {}]   ;;  %s842_s3 = inlined_call_operand.hbm [shape: f32[2,8,196], index: 3, kind: output, shape index: {}]  }
   0x1   :  { %9 = vsyncpa [#allocation4], 0  ;;  %s652_s12 = smov [#allocation2]   ;;  %s604_s16 = scalar_lea.hbm %s839_s0, 256 }
   0x2   :  { %s15_s13 = sshll.u32 %s652_s12, 4  ;;  %p605_p0 = scmp.ne.s32.totalorder %s839_s0, %s604_s16  ;;  %s16_s13 = int_to_ptr.vmem [resolvable:$true] %s15_s13 }
   0x3   :  { %p608_p1 = scmp.lt.u32.totalorder %s604_s16, %s839_s0 }
   0x5   :  { %p610_p2 = pnand %p608_p1, %p605_p0 }
   0x7   :  { %613 = shalt.err (!%p610_p2)
}
   0x8   :  { %s614_s21 = scalar_lea.vmem %s16_s13, 256  ;;  %p619_p4 = scmp.lt.s32.totalorder %s16_s13, %s16_s13 }
   0x9   :  { %p615_p3 = scmp.ne.s32.totalorder %s16_s13, %s614_s21  ;;  %p620_p5 = scmp.lt.s32.totalorder %s614_s21, %s614_s21 }
   0xb   :  { %p621_p6 = por %p620_p5, %p619_p4 }
   0xd   :  { %p622_p7 = pnand %p621_p6, %p615_p3 }
   0xf   :  { %625 = shalt.err (!%p622_p7)
}
  0x10   :  { %s653_s22 = smov 128   ;;  %s654_s23 = smov 8  }
  0x11   :  { %21 = dma.hbm_to_vmem [thread:$0]  %s839_s0, 256, %s16_s13, [#allocation3], %s653_s22, %s653_s22, %s654_s23  }
  0x12   :  { %648 = dma.done.wait [#allocation3], 256  }
  0x13   :  { %649 = vsyncadd [#allocation3], 4294967040  ;;  %v710_v0 = vld [vmem:[#allocation2] sm:$0xff]  ;;  %v712_v1 = vld [vmem:[#allocation2 + $0x8] sm:$0xff]  ;;  %s655_s26 = smov 112   ;;  %s656_s0 = smov 127  }
  0x14   :  { %v35_v2 = vcombine.low %v710_v0, %v710_v0  ;;  %v266_v3 = vcombine.low %v712_v1, %v712_v1  ;;  %v33_v4 = vcombine.high %v710_v0, %v710_v0  ;;  %v726_v8 = vcombine.high %v712_v1, %v712_v1  ;;  %s657_s27 = smov 126   ;;  %s658_s28 = smov 110   ;;  %v30_v12 = vld [vmem:[%s841_s2] sm:$0xff] }
  0x15   :  { %s659_s29 = smov 111   ;;  %s660_s30 = smov 95   ;;  %v662_v10 = vmov 0.0   ;;  %v663_v11 = vmov 0   ;;  %vm40_vm0 = vcmask 1039360   ;;  %vm98_vm1 = vcmask 1043456  }
  0x16   :  { %v538_v5 = vpack.i.bf16 %v710_v0, %v35_v2  ;;  %v543_v6 = vpack.i.bf16 %v712_v1, %v266_v3  ;;  %v533_v7 = vpack.i.bf16 %v33_v4, %v710_v0  ;;  %v548_v9 = vpack.i.bf16 %v726_v8, %v712_v1  ;;  %s661_s4 = smov 96   ;;  %179 = vmatprep.mubr.f32.mxu0 %v662_v10  ;;  %s664_s5 = smov 94  }
  0x17   :  { %397 = vmatprep.mubr.f32.mxu1 %v662_v10  ;;  %598 = vset.pattern.permute.xlu1 %v663_v11  ;;  %vm48_vm2 = vcmask 1031168   ;;  %vm56_vm3 = vcmask 916480   ;;  %vm72_vm4 = vcmask 900096   ;;  %vm64_vm5 = vcmask 908288   ;;  %s666_s9 = smov 122   ;;  %s667_s10 = smov 120  }
  0x18   :  { %539 = vrot.lane.b32.xlu1 %v538_v5, %s655_s26  ;;  %529 = vrot.lane.b32.xlu0 %v538_v5, %s656_s0  ;;  %vm88_vm6 = vcmask 777216   ;;  %vm80_vm7 = vcmask 785408   ;;  %vm96_vm8 = vcmask 769024   ;;  %vm107_vm9 = vcmask 293888   ;;  %s668_s11 = smov 118   ;;  %s669_s12 = smov 116  }
  0x19   :  { %599 = vset.pattern.permute.xlu0 %v663_v11  ;;  %s670_s13 = smov 114   ;;  %s671_s14 = smov 108   ;;  %vm227_vm10 = vcmask 113664   ;;  %vm229_vm11 = vcmask 228352   ;;  %vm231_vm12 = vcmask 343040   ;;  %vm233_vm13 = vcmask 457728  }
  0x1a   :  { %s672_s15 = smov 106   ;;  %s673_s16 = smov 104   ;;  %vm235_vm14 = vcmask 572416   ;;  %vm237_vm15 = vcmask 687104  }
  0x1b   :  { %s674_s17 = smov 102   ;;  %s675_s18 = smov [#allocation5]  }
  0x1c   :  { %544 = vrot.lane.b32.xlu1 %v543_v6, %s656_s0  ;;  %534 = vrot.lane.b32.xlu0 %v533_v7, %s657_s27  ;;  %s468_s19 = sshll.u32 %s675_s18, 4  ;;  %s469_s19 = int_to_ptr.vmem [resolvable:$true] %s468_s19 }
  0x1d   :  { %s626_s20 = scalar_lea.vmem %s469_s19, 512  ;;  %p631_p9 = scmp.lt.s32.totalorder %s469_s19, %s469_s19 }
  0x1e   :  { %p627_p8 = scmp.ne.s32.totalorder %s469_s19, %s626_s20  ;;  %p632_p10 = scmp.lt.s32.totalorder %s626_s20, %s626_s20 }
  0x20   :  { %554 = vrot.lane.b32.xlu1 %v543_v6, %s655_s26  ;;  %549 = vrot.lane.b32.xlu0 %v548_v9, %s657_s27  ;;  %p633_p11 = por %p632_p10, %p631_p9 }
  0x22   :  { %p634_p12 = pnand %p633_p11, %p627_p8 }
  0x24   :  { %564 = vrot.lane.b32.xlu1 %v538_v5, %s658_s28  ;;  %559 = vrot.lane.b32.xlu0 %v533_v7, %s659_s29 }
  0x28   :  { %574 = vrot.lane.b32.xlu1 %v538_v5, %s660_s30  ;;  %569 = vrot.lane.b32.xlu0 %v533_v7, %s661_s4 }
  0x2c   :  { %584 = vrot.lane.b32.xlu1 %v543_v6, %s658_s28  ;;  %579 = vrot.lane.b32.xlu0 %v548_v9, %s659_s29 }
  0x30   :  { %594 = vrot.lane.b32.xlu1 %v543_v6, %s660_s30  ;;  %589 = vrot.lane.b32.xlu0 %v548_v9, %s661_s4 }
  0x34   :  { %94 = vrot.lane.b32.xlu1 %v33_v4, %s664_s5  ;;  %92 = vrot.lane.b32.xlu0 %v710_v0, %s664_s5 }
  0x38   :  { %318 = vrot.lane.b32.xlu1 %v726_v8, %s664_s5  ;;  %316 = vrot.lane.b32.xlu0 %v712_v1, %s664_s5 }
  0x3c   :  { %253 = vperm.xlu1 %598, %v30_v12  }
  0x8a   :  { %v540_v13 = vpop.permute.xlu1 %539  ;;  %v530_v14 = vpop.permute.xlu0 %529 }
  0x8b   :  { %v532_v15 = vunpack.i.h.bf16 %v530_v14  ;;  %v531_v16 = vunpack.i.l.bf16 %v530_v14  ;;  %v542_v17 = vunpack.i.h.bf16 %v540_v13  ;;  %v541_v18 = vunpack.i.l.bf16 %v540_v13 }
  0x8d   :  { %v41_v21 = vsel %vm40_vm0, %v531_v16, %v532_v15  ;;  %v100_v26 = vsel %vm98_vm1, %v33_v4, %v532_v15  ;;  %v57_v29 = vsel %vm56_vm3, %v541_v18, %v542_v17 }
  0x8e   :  { %v545_v19 = vpop.permute.xlu1 %544  ;;  %v535_v20 = vpop.permute.xlu0 %534  ;;  %v99_v33 = vsel %vm98_vm1, %v710_v0, %v41_v21 }
  0x8f   :  { %v547_v22 = vunpack.i.h.bf16 %v545_v19  ;;  %v546_v23 = vunpack.i.l.bf16 %v545_v19  ;;  %v537_v24 = vunpack.i.h.bf16 %v535_v20  ;;  %v536_v25 = vunpack.i.l.bf16 %v535_v20 }
  0x91   :  { %v102_v27 = vsel %vm98_vm1, %v537_v24, %v542_v17  ;;  %v49_v28 = vsel %vm48_vm2, %v536_v25, %v537_v24  ;;  %v271_v35 = vsel %vm40_vm0, %v546_v23, %v547_v22  ;;  %v322_v41 = vsel %vm98_vm1, %v726_v8, %v547_v22 }
  0x92   :  { %v555_v30 = vpop.permute.xlu1 %554  ;;  %v550_v31 = vpop.permute.xlu0 %549  ;;  %v486_v32 = vpack.c.bf16 %v102_v27, %v100_v26  ;;  %v101_v34 = vsel %vm98_vm1, %v49_v28, %v57_v29  ;;  %v321_v48 = vsel %vm98_vm1, %v712_v1, %v271_v35  ;;  %v29_v28 = vld [vmem:[%s840_s1] sm:$0xff]  ;;  %s665_s1 = smov 124   ;;  %vm239_vm0 = vcmask 801792  }
  0x93   :  { %v557_v36 = vunpack.i.h.bf16 %v555_v30  ;;  %v556_v37 = vunpack.i.l.bf16 %v555_v30  ;;  %v552_v38 = vunpack.i.h.bf16 %v550_v31  ;;  %v551_v39 = vunpack.i.l.bf16 %v550_v31 }
  0x94   :  { %487 = vmatprep.subr.bf16.mxu0 %v486_v32  ;;  %v488_v40 = vpack.c.bf16 %v101_v34, %v99_v33 }
  0x95   :  { %v324_v42 = vsel %vm98_vm1, %v552_v38, %v557_v36  ;;  %v278_v43 = vsel %vm48_vm2, %v551_v39, %v552_v38  ;;  %v285_v44 = vsel %vm56_vm3, %v556_v37, %v557_v36 }
  0x96   :  { %489 = vmatpush1.bf16.msra.mxu0 %v488_v40  ;;  %v565_v45 = vpop.permute.xlu1 %564  ;;  %v560_v46 = vpop.permute.xlu0 %559  ;;  %v494_v47 = vpack.c.bf16 %v324_v42, %v322_v41  ;;  %v323_v49 = vsel %vm98_vm1, %v278_v43, %v285_v44 }
  0x97   :  { %v567_v50 = vunpack.i.h.bf16 %v565_v45  ;;  %v566_v51 = vunpack.i.l.bf16 %v565_v45  ;;  %v562_v52 = vunpack.i.h.bf16 %v560_v46  ;;  %v561_v53 = vunpack.i.l.bf16 %v560_v46 }
  0x98   :  { %495 = vmatprep.subr.bf16.mxu1 %v494_v47  ;;  %v496_v54 = vpack.c.bf16 %v323_v49, %v321_v48 }
  0x99   :  { %v73_v55 = vsel %vm72_vm4, %v566_v51, %v567_v50  ;;  %v65_v56 = vsel %vm64_vm5, %v561_v53, %v562_v52  ;;  %v104_v1 = vsel %vm98_vm1, %v562_v52, %v567_v50 }
  0x9a   :  { %497 = vmatpush1.bf16.msra.mxu1 %v496_v54  ;;  %v575_v57 = vpop.permute.xlu1 %574  ;;  %v570_v58 = vpop.permute.xlu0 %569  ;;  %v103_v6 = vsel %vm98_vm1, %v65_v56, %v73_v55 }
  0x9b   :  { %v577_v59 = vunpack.i.h.bf16 %v575_v57  ;;  %v576_v60 = vunpack.i.l.bf16 %v575_v57  ;;  %v572_v61 = vunpack.i.h.bf16 %v570_v58  ;;  %v571_v62 = vunpack.i.l.bf16 %v570_v58 }
  0x9d   :  { %v89_v63 = vsel %vm88_vm6, %v576_v60, %v577_v59  ;;  %v81_v0 = vsel %vm80_vm7, %v571_v62, %v572_v61  ;;  %v106_v2 = vsel %vm98_vm1, %v572_v61, %v577_v59 }
  0x9e   :  { %v585_v3 = vpop.permute.xlu1 %584  ;;  %v580_v4 = vpop.permute.xlu0 %579  ;;  %v490_v5 = vpack.c.bf16 %v106_v2, %v104_v1  ;;  %v105_v7 = vsel %vm98_vm1, %v81_v0, %v89_v63 }
  0x9f   :  { %v587_v8 = vunpack.i.h.bf16 %v585_v3  ;;  %v586_v9 = vunpack.i.l.bf16 %v585_v3  ;;  %v582_v10 = vunpack.i.h.bf16 %v580_v4  ;;  %v581_v11 = vunpack.i.l.bf16 %v580_v4 }
  0xa0   :  { %491 = vmatprep.subr.bf16.mxu0 %v490_v5  ;;  %v492_v12 = vpack.c.bf16 %v105_v7, %v103_v6 }
  0xa1   :  { %v299_v13 = vsel %vm72_vm4, %v586_v9, %v587_v8  ;;  %v292_v14 = vsel %vm64_vm5, %v581_v11, %v582_v10  ;;  %v326_v23 = vsel %vm98_vm1, %v582_v10, %v587_v8  ;;  %vm245_vm4 = vcmask 211968  }
  0xa2   :  { %493 = vmatpush1.bf16.msra.mxu0 %v492_v12  ;;  %v595_v15 = vpop.permute.xlu1 %594  ;;  %v590_v16 = vpop.permute.xlu0 %589  ;;  %v325_v29 = vsel %vm98_vm1, %v292_v14, %v299_v13  ;;  %vm247_vm5 = vcmask 326656  }
  0xa3   :  { %v597_v17 = vunpack.i.h.bf16 %v595_v15  ;;  %v596_v18 = vunpack.i.l.bf16 %v595_v15  ;;  %v592_v19 = vunpack.i.h.bf16 %v590_v16  ;;  %v591_v20 = vunpack.i.l.bf16 %v590_v16 }
  0xa5   :  { %v313_v21 = vsel %vm88_vm6, %v596_v18, %v597_v17  ;;  %v306_v22 = vsel %vm80_vm7, %v591_v20, %v592_v19  ;;  %v328_v24 = vsel %vm98_vm1, %v592_v19, %v597_v17  ;;  %vm249_vm6 = vcmask 441344  }
  0xa6   :  { %v95_v25 = vpop.permute.xlu1 %94  ;;  %v93_v26 = vpop.permute.xlu0 %92  ;;  %v498_v27 = vpack.c.bf16 %v328_v24, %v326_v23  ;;  %v327_v30 = vsel %vm98_vm1, %v306_v22, %v313_v21  ;;  %vm259_vm7 = vcmask 556032  }
  0xa7   :  { %v97_v31 = vsel %vm96_vm8, %v93_v26, %v95_v25  ;;  %480 = vmatprep.subr.msk.mxu0 %vm98_vm1, %v95_v25  ;;  %v500_v32 = vpack.c.bf16 %v327_v30, %v325_v29 }
  0xa8   :  { %481 = vmatpush1.msk.msra.mxu0 %vm98_vm1, %v97_v31  ;;  %499 = vmatprep.subr.bf16.mxu1 %v498_v27 }
  0xa9   :  { %482 = vmatmul.mubr.msk.f32.vlgmr.msra.gmra.mrb[0].mxu0 %vm107_vm9, %v29_v28  ;;  %501 = vmatpush1.bf16.msra.mxu1 %v500_v32 }
  0xaa   :  { %v319_v33 = vpop.permute.xlu1 %318  ;;  %v317_v34 = vpop.permute.xlu0 %316 }
  0xab   :  { %v320_v35 = vsel %vm96_vm8, %v317_v34, %v319_v33  ;;  %483 = vmatprep.subr.msk.mxu1 %vm98_vm1, %v319_v33 }
  0xad   :  { %484 = vmatpush1.msk.msra.mxu1 %vm98_vm1, %v320_v35  ;;  %vm243_vm1 = vcmask 97280  }
  0xae   :  { %485 = vmatmul.mubr.msk.f32.vlgmr.msra.gmra.mrb[0].mxu1 %vm107_vm9, %v29_v28 }
  0xbb   :  { %v798_v40 = vpop.permute.xlu1 %253 }
 0x17c   :  { %v181_v36 = vpop.f32.mrb[0].mxu0 }
 0x17d   :  { %187 = vrot.lane.b32.xlu0 %v181_v36, %s657_s27  ;;  %v183_v37 = vpop.f32.mrb[1].mxu0 }
 0x181   :  { %v784_v38 = vpop.f32.mrb[0].mxu1  ;;  %190 = vrot.lane.b32.xlu0 %v181_v36, %s665_s1 }
 0x182   :  { %405 = vrot.lane.b32.xlu1 %v784_v38, %s657_s27  ;;  %v401_v39 = vpop.f32.mrb[1].mxu1 }
 0x185   :  { %193 = vrot.lane.b32.xlu0 %v181_v36, %s666_s9 }
 0x186   :  { %408 = vrot.lane.b32.xlu1 %v784_v38, %s665_s1 }
 0x189   :  { %411 = vrot.lane.b32.xlu0 %v784_v38, %s666_s9 }
 0x18a   :  { %196 = vrot.lane.b32.xlu1 %v181_v36, %s667_s10 }
 0x18d   :  { %414 = vrot.lane.b32.xlu0 %v784_v38, %s667_s10 }
 0x18e   :  { %199 = vrot.lane.b32.xlu1 %v181_v36, %s668_s11 }
 0x191   :  { %417 = vrot.lane.b32.xlu0 %v784_v38, %s668_s11 }
 0x192   :  { %202 = vrot.lane.b32.xlu1 %v181_v36, %s669_s12 }
 0x195   :  { %420 = vrot.lane.b32.xlu0 %v784_v38, %s669_s12 }
 0x196   :  { %205 = vrot.lane.b32.xlu1 %v181_v36, %s670_s13 }
 0x199   :  { %212 = vrot.lane.b32.xlu0 %v183_v37, %s658_s28 }
 0x19a   :  { %423 = vrot.lane.b32.xlu1 %v784_v38, %s670_s13 }
 0x19d   :  { %433 = vrot.lane.b32.xlu0 %v401_v39, %s671_s14 }
 0x19e   :  { %215 = vrot.lane.b32.xlu1 %v183_v37, %s671_s14 }
 0x1a1   :  { %218 = vrot.lane.b32.xlu0 %v183_v37, %s672_s15 }
 0x1a2   :  { %430 = vrot.lane.b32.xlu1 %v401_v39, %s658_s28 }
 0x1a5   :  { %436 = vrot.lane.b32.xlu0 %v401_v39, %s672_s15 }
 0x1a6   :  { %209 = vrot.lane.b32.xlu1 %v183_v37, %s655_s26 }
 0x1a9   :  { %221 = vrot.lane.b32.xlu0 %v183_v37, %s673_s16 }
 0x1aa   :  { %427 = vrot.lane.b32.xlu1 %v401_v39, %s655_s26 }
 0x1ad   :  { %439 = vrot.lane.b32.xlu0 %v401_v39, %s673_s16 }
 0x1ae   :  { %224 = vrot.lane.b32.xlu1 %v183_v37, %s674_s17 }
 0x1b1   :  { %442 = vrot.lane.b32.xlu0 %v401_v39, %s674_s17 }
 0x1ef   :  { %v188_v41 = vpop.permute.xlu0 %187 }
 0x1f0   :  { %v228_v58 = vsel %vm227_vm10, %v181_v36, %v188_v41 }
 0x1f3   :  { %v191_v42 = vpop.permute.xlu0 %190 }
 0x1f4   :  { %v406_v43 = vpop.permute.xlu1 %405  ;;  %v230_v59 = vsel %vm229_vm11, %v228_v58, %v191_v42 }
 0x1f5   :  { %v445_v0 = vsel %vm227_vm10, %v784_v38, %v406_v43 }
 0x1f7   :  { %v194_v44 = vpop.permute.xlu0 %193 }
 0x1f8   :  { %v409_v45 = vpop.permute.xlu1 %408  ;;  %v232_v61 = vsel %vm231_vm12, %v230_v59, %v194_v44 }
 0x1f9   :  { %v446_v2 = vsel %vm229_vm11, %v445_v0, %v409_v45 }
 0x1fb   :  { %v412_v46 = vpop.permute.xlu0 %411 }
 0x1fc   :  { %v197_v47 = vpop.permute.xlu1 %196  ;;  %v447_v5 = vsel %vm231_vm12, %v446_v2, %v412_v46 }
 0x1fd   :  { %v234_v63 = vsel %vm233_vm13, %v232_v61, %v197_v47 }
 0x1ff   :  { %v415_v48 = vpop.permute.xlu0 %414 }
 0x200   :  { %v200_v49 = vpop.permute.xlu1 %199  ;;  %v448_v8 = vsel %vm233_vm13, %v447_v5, %v415_v48 }
 0x201   :  { %v236_v1 = vsel %vm235_vm14, %v234_v63, %v200_v49 }
 0x203   :  { %v418_v50 = vpop.permute.xlu0 %417 }
 0x204   :  { %v203_v51 = vpop.permute.xlu1 %202  ;;  %v449_v10 = vsel %vm235_vm14, %v448_v8, %v418_v50 }
 0x205   :  { %v238_v3 = vsel %vm237_vm15, %v236_v1, %v203_v51 }
 0x207   :  { %v421_v52 = vpop.permute.xlu0 %420 }
 0x208   :  { %v206_v53 = vpop.permute.xlu1 %205  ;;  %v450_v12 = vsel %vm237_vm15, %v449_v10, %v421_v52 }
 0x209   :  { %v240_v6 = vsel %vm239_vm0, %v238_v3, %v206_v53 }
 0x20b   :  { %v213_v54 = vpop.permute.xlu0 %212 }
 0x20c   :  { %v424_v55 = vpop.permute.xlu1 %423 }
 0x20d   :  { %v451_v15 = vsel %vm239_vm0, %v450_v12, %v424_v55 }
 0x20f   :  { %v434_v56 = vpop.permute.xlu0 %433 }
 0x210   :  { %v216_v57 = vpop.permute.xlu1 %215 }
 0x211   :  { %v244_v18 = vsel %vm243_vm1, %v213_v54, %v216_v57 }
 0x213   :  { %v219_v60 = vpop.permute.xlu0 %218 }
 0x214   :  { %v431_v62 = vpop.permute.xlu1 %430  ;;  %v246_v20 = vsel %vm245_vm4, %v244_v18, %v219_v60 }
 0x215   :  { %v454_v25 = vsel %vm243_vm1, %v431_v62, %v434_v56 }
 0x217   :  { %v437_v4 = vpop.permute.xlu0 %436 }
 0x218   :  { %v210_v7 = vpop.permute.xlu1 %209  ;;  %v455_v27 = vsel %vm245_vm4, %v454_v25, %v437_v4 }
 0x219   :  { %v241_v9 = vsel %vm56_vm3, %v240_v6, %v210_v7 }
 0x21a   :  { %v242_v11 = vsel %vm48_vm2, %v241_v9, %v213_v54 }
 0x21b   :  { %v256_v13 = vadd.f32 %v798_v40, %v242_v11  ;;  %v222_v14 = vpop.permute.xlu0 %221 }
 0x21c   :  { %v428_v16 = vpop.permute.xlu1 %427  ;;  %v248_v23 = vsel %vm247_vm5, %v246_v20, %v222_v14 }
 0x21d   :  { %258 = vst [vmem:[#allocation5] sm:$0xff] %v256_v13  ;;  %v452_v17 = vsel %vm56_vm3, %v451_v15, %v428_v16 }
 0x21e   :  { %v453_v19 = vsel %vm48_vm2, %v452_v17, %v431_v62 }
 0x21f   :  { %v458_v21 = vadd.f32 %v453_v19, %v798_v40  ;;  %v440_v22 = vpop.permute.xlu0 %439 }
 0x220   :  { %v225_v24 = vpop.permute.xlu1 %224  ;;  %v456_v29 = vsel %vm247_vm5, %v455_v27, %v440_v22 }
 0x221   :  { %461 = vst [vmem:[#allocation5 + $0x10] sm:$0xff] %v458_v21  ;;  %v250_v26 = vsel %vm249_vm6, %v248_v23, %v225_v24 }
 0x222   :  { %v257_v28 = vadd.f32 %v798_v40, %v250_v26 }
 0x223   :  { %v443_v30 = vpop.permute.xlu0 %442 }
 0x224   :  { %260 = vst.msk [vmem:[#allocation5 + $0x8] sm:$0xff] %vm259_vm7, %v257_v28  ;;  %v457_v31 = vsel %vm249_vm6, %v456_v29, %v443_v30 }
 0x225   :  { %v459_v32 = vadd.f32 %v457_v31, %v798_v40 }
 0x227   :  { %462 = vst.msk [vmem:[#allocation5 + $0x18] sm:$0xff] %vm259_vm7, %v459_v32 }
 0x228   :  { %637 = shalt.err (!%p634_p12)
}
 0x229   :  { %s638_s23 = scalar_lea.hbm %s842_s3, 512 }
 0x22a   :  { %p639_p13 = scmp.ne.s32.totalorder %s842_s3, %s638_s23  ;;  %p642_p0 = scmp.lt.u32.totalorder %s638_s23, %s842_s3 }
 0x22c   :  { %p644_p1 = pnand %p642_p0, %p639_p13 }
 0x22e   :  { %647 = shalt.err (!%p644_p1)
}
 0x22f   :  { %s676_s27 = smov 256   ;;  %s677_s28 = smov 16  }
 0x230   :  { %474 = dma.vmem_to_hbm [thread:$0]  %s469_s19, 512, %s842_s3, [#allocation4], %s676_s27, %s676_s27, %s677_s28  }
 0x231   :  { %650 = dma.done.wait [#allocation4], 512  }
 0x232   :  { %651 = vsyncadd [#allocation4], 4294966784 }
 0x233   :  { %478 = vsyncpa [#allocation3], 1 }
 0x234   :  { %479 = vsyncpa [#allocation4], 1 }

</bundles_post_ra>
